<compile_context>
chip_gen: v7x
topology: tpu7x:2x2x1
jax: 0.10.0
libtpu: 0.0.40
codegen_flags: <defaults>
</compile_context>

<pallas_src>
import jax
import jax.numpy as jnp
import numpy as np
from jax.experimental import pallas as pl
from jax.experimental.pallas import tpu as pltpu

# Largest queryL tile per grid step (lanes). Multiple of 128; keeps
# (seg tile + ctx tile) * double-buffering comfortably inside VMEM even on
# v7x's smaller budget for typical cdf/sourceL.
_MAX_TQ = 2048


def _attention_kernel(w_ref, emb_ref, seg_ref, ctx_ref, src_ref):
    # w_ref:   [cdf, cdf]          1x1 conv weight (squeezed, bias-free)
    # emb_ref: [B, cdf, sourceL]   full att_emb (same block every tile)
    # seg_ref: [B, sourceL, tq]    current queryL tile of flattened seg
    # ctx_ref: [B, cdf, tq]        current queryL tile of weightedContext
    # src_ref: [B, cdf, sourceL]   f32 scratch holding sourceT = W @ att_emb
    batch = emb_ref.shape[0]

    # sourceT does not depend on queryL: compute it once, reuse across tiles.
    @pl.when(pl.program_id(0) == 0)
    def _():
        w = w_ref[...]
        for b in range(batch):
            src_ref[b] = jnp.dot(w, emb_ref[b],
                                 preferred_element_type=jnp.float32)

    # weightedContext[b] = sourceT[b] @ attn[b]; seg stays in its native dtype.
    for b in range(batch):
        ctx_ref[b] = jnp.dot(src_ref[b], seg_ref[b],
                             preferred_element_type=jnp.float32
                             ).astype(ctx_ref.dtype)


def global_attention_general(seg, att_emb, conv_weight):
    """Landscape-mode GlobalAttentionGeneral forward.

    seg:         [B, sourceL, ih, iw]   (idf == sourceL in landscape mode)
    att_emb:     [B, cdf, sourceL]
    conv_weight: [cdf, cdf]             (1x1 conv weight, no bias)
    returns (weightedContext [B, cdf, ih, iw], attn [B, sourceL, ih, iw])
    """
    B, sourceL, ih, iw = seg.shape
    _, cdf, sL2 = att_emb.shape
    assert sL2 == sourceL, "landscape branch requires idf == sourceL"
    queryL = ih * iw

    seg_flat = seg.reshape(B, sourceL, queryL)

    # Tile queryL only if it is large; otherwise one grid step does everything.
    if queryL <= _MAX_TQ:
        tq = queryL
        num_q = 1
    else:
        tq = _MAX_TQ
        num_q = pl.cdiv(queryL, tq)

    ctx_flat = pl.pallas_call(
        _attention_kernel,
        out_shape=jax.ShapeDtypeStruct((B, cdf, queryL), att_emb.dtype),
        grid_spec=pltpu.PrefetchScalarGridSpec(
            num_scalar_prefetch=0,
            grid=(num_q,),
            in_specs=[
                pl.BlockSpec((cdf, cdf), lambda qi: (0, 0)),
                pl.BlockSpec((B, cdf, sourceL), lambda qi: (0, 0, 0)),
                pl.BlockSpec((B, sourceL, tq), lambda qi: (0, 0, qi)),
            ],
            out_specs=pl.BlockSpec((B, cdf, tq), lambda qi: (0, 0, qi)),
            scratch_shapes=[pltpu.VMEM((B, cdf, sourceL), jnp.float32)],
        ),
        compiler_params=pltpu.CompilerParams(
            dimension_semantics=("arbitrary",)),
    )(conv_weight, att_emb, seg_flat)

    weighted_context = ctx_flat.reshape(B, cdf, ih, iw)
    # attn in landscape mode is exactly seg (view-only round trip in PyTorch);
    # return it without routing it through the kernel.
    attn = seg
    return weighted_context, attn


if __name__ == "__main__":
    # Small shapes consistent with the module's forward (landscape mode):
    # idf == sourceL = 8, cdf = 32, ih = iw = 16, batch = 2.
    B, sourceL, cdf, ih, iw = 2, 8, 32, 16, 16

    key = jax.random.PRNGKey(0)
    k_seg, k_emb, k_w = jax.random.split(key, 3)

    seg = jax.random.normal(k_seg, (B, sourceL, ih, iw), dtype=jnp.float32)
    att_emb = jax.random.normal(k_emb, (B, cdf, sourceL), dtype=jnp.float32)
    # 1x1-conv weight (PyTorch shape [cdf, cdf, 1, 1], bias=False), squeezed.
    conv_weight = 0.05 * jax.random.normal(k_w, (cdf, cdf), dtype=jnp.float32)

    weighted_context, attn = global_attention_general(seg, att_emb, conv_weight)
    jax.block_until_ready((weighted_context, attn))

    # Pure-JAX reference check.
    seg_flat = seg.reshape(B, sourceL, ih * iw)
    source_t_ref = jnp.einsum("oc,bcs->bos", conv_weight, att_emb)
    ctx_ref = jnp.einsum("bcs,bsq->bcq", source_t_ref, seg_flat).reshape(
        B, cdf, ih, iw)
    attn_ref = seg_flat.reshape(B, sourceL, ih, iw)

    assert np.allclose(np.asarray(weighted_context), np.asarray(ctx_ref),
                       rtol=1e-5, atol=1e-5)
    assert np.allclose(np.asarray(attn), np.asarray(attn_ref))

    print("KERNEL_OK")
</pallas_src>

<mosaic_0001>
module attributes {stable_mosaic.version = 11 : i64} {
  func.func @_attention_kernel(%arg0: i32, %arg1: memref<32x32xf32, #tpu.memory_space<vmem>>, %arg2: memref<2x32x8xf32, #tpu.memory_space<vmem>>, %arg3: memref<2x8x256xf32, #tpu.memory_space<vmem>>, %arg4: memref<2x32x256xf32, #tpu.memory_space<vmem>>, %arg5: memref<2x32x8xf32, #tpu.memory_space<vmem>>) attributes {dimension_semantics = [#tpu.dimension_semantics<arbitrary>], iteration_bounds = array<i64: 1>, scalar_prefetch = 0 : i64, scratch_operands = 1 : i64, tpu.core_type = #tpu.core_type<tc>, window_params = [{pipeline_mode = #tpu.pipeline_mode<synchronous>, transform_indices = @transform_0, window_bounds = array<i64: 32, 32>}, {pipeline_mode = #tpu.pipeline_mode<synchronous>, transform_indices = @transform_1, window_bounds = array<i64: 2, 32, 8>}, {transform_indices = @transform_2, window_bounds = array<i64: 2, 8, 256>}, {transform_indices = @transform_3, window_bounds = array<i64: 2, 32, 256>}]} {
    %c0_i32 = arith.constant 0 : i32
    %0 = arith.cmpi eq, %arg0, %c0_i32 : i32
    %1 = arith.extui %0 : i1 to i32
    %c0_i32_0 = arith.constant 0 : i32
    %2 = arith.cmpi ne, %1, %c0_i32_0 : i32
    scf.if %2 {
      %c0_18 = arith.constant 0 : index
      %c0_19 = arith.constant 0 : index
      %19 = vector.load %arg1[%c0_18, %c0_19] : memref<32x32xf32, #tpu.memory_space<vmem>>, vector<32x32xf32>
      %c0_20 = arith.constant 0 : index
      %c0_21 = arith.constant 0 : index
      %c0_22 = arith.constant 0 : index
      %20 = vector.load %arg2[%c0_20, %c0_21, %c0_22] : memref<2x32x8xf32, #tpu.memory_space<vmem>>, vector<1x32x8xf32>
      %21 = vector.shape_cast %20 : vector<1x32x8xf32> to vector<32x8xf32>
      %cst_23 = arith.constant dense<0.000000e+00> : vector<32x8xf32>
      %22 = tpu.matmul %19, %21, %cst_23 {dimension_numbers = #tpu.dot_dimension_numbers<[1], [0], [0], [1], [0, 0, 1, 1], [], []>} : vector<32x32xf32>, vector<32x8xf32>, vector<32x8xf32> -> vector<32x8xf32>
      %c0_24 = arith.constant 0 : index
      %c0_25 = arith.constant 0 : index
      %c0_26 = arith.constant 0 : index
      %23 = vector.load %arg5[%c0_24, %c0_25, %c0_26] : memref<2x32x8xf32, #tpu.memory_space<vmem>>, vector<1x32x8xf32>
      %24 = vector.shape_cast %23 : vector<1x32x8xf32> to vector<32x8xf32>
      %25 = vector.shape_cast %22 : vector<32x8xf32> to vector<1x32x8xf32>
      tpu.vector_store %arg5[%c0_24, %c0_25, %c0_26], %25 {strides = array<i32>} : memref<2x32x8xf32, #tpu.memory_space<vmem>>, vector<1x32x8xf32>,
      %c1_27 = arith.constant 1 : index
      %c0_28 = arith.constant 0 : index
      %c0_29 = arith.constant 0 : index
      %26 = vector.load %arg2[%c1_27, %c0_28, %c0_29] : memref<2x32x8xf32, #tpu.memory_space<vmem>>, vector<1x32x8xf32>
      %27 = vector.shape_cast %26 : vector<1x32x8xf32> to vector<32x8xf32>
      %cst_30 = arith.constant dense<0.000000e+00> : vector<32x8xf32>
      %28 = tpu.matmul %19, %27, %cst_30 {dimension_numbers = #tpu.dot_dimension_numbers<[1], [0], [0], [1], [0, 0, 1, 1], [], []>} : vector<32x32xf32>, vector<32x8xf32>, vector<32x8xf32> -> vector<32x8xf32>
      %c1_31 = arith.constant 1 : index
      %c0_32 = arith.constant 0 : index
      %c0_33 = arith.constant 0 : index
      %29 = vector.load %arg5[%c1_31, %c0_32, %c0_33] : memref<2x32x8xf32, #tpu.memory_space<vmem>>, vector<1x32x8xf32>
      %30 = vector.shape_cast %29 : vector<1x32x8xf32> to vector<32x8xf32>
      %31 = vector.shape_cast %28 : vector<32x8xf32> to vector<1x32x8xf32>
      tpu.vector_store %arg5[%c1_31, %c0_32, %c0_33], %31 {strides = array<i32>} : memref<2x32x8xf32, #tpu.memory_space<vmem>>, vector<1x32x8xf32>,
    } else {
    }
    %c0 = arith.constant 0 : index
    %c0_1 = arith.constant 0 : index
    %c0_2 = arith.constant 0 : index
    %3 = vector.load %arg5[%c0, %c0_1, %c0_2] : memref<2x32x8xf32, #tpu.memory_space<vmem>>, vector<1x32x8xf32>
    %4 = vector.shape_cast %3 : vector<1x32x8xf32> to vector<32x8xf32>
    %c0_3 = arith.constant 0 : index
    %c0_4 = arith.constant 0 : index
    %c0_5 = arith.constant 0 : index
    %5 = vector.load %arg3[%c0_3, %c0_4, %c0_5] : memref<2x8x256xf32, #tpu.memory_space<vmem>>, vector<1x8x256xf32>
    %6 = vector.shape_cast %5 : vector<1x8x256xf32> to vector<8x256xf32>
    %cst = arith.constant dense<0.000000e+00> : vector<32x256xf32>
    %7 = tpu.matmul %4, %6, %cst {dimension_numbers = #tpu.dot_dimension_numbers<[1], [0], [0], [1], [0, 0, 1, 1], [], []>} : vector<32x8xf32>, vector<8x256xf32>, vector<32x256xf32> -> vector<32x256xf32>
    %c0_6 = arith.constant 0 : index
    %c0_7 = arith.constant 0 : index
    %c0_8 = arith.constant 0 : index
    %8 = vector.load %arg4[%c0_6, %c0_7, %c0_8] : memref<2x32x256xf32, #tpu.memory_space<vmem>>, vector<1x32x256xf32>
    %9 = vector.shape_cast %8 : vector<1x32x256xf32> to vector<32x256xf32>
    %10 = vector.shape_cast %7 : vector<32x256xf32> to vector<1x32x256xf32>
    tpu.vector_store %arg4[%c0_6, %c0_7, %c0_8], %10 {strides = array<i32>} : memref<2x32x256xf32, #tpu.memory_space<vmem>>, vector<1x32x256xf32>,
    %c1 = arith.constant 1 : index
    %c0_9 = arith.constant 0 : index
    %c0_10 = arith.constant 0 : index
    %11 = vector.load %arg5[%c1, %c0_9, %c0_10] : memref<2x32x8xf32, #tpu.memory_space<vmem>>, vector<1x32x8xf32>
    %12 = vector.shape_cast %11 : vector<1x32x8xf32> to vector<32x8xf32>
    %c1_11 = arith.constant 1 : index
    %c0_12 = arith.constant 0 : index
    %c0_13 = arith.constant 0 : index
    %13 = vector.load %arg3[%c1_11, %c0_12, %c0_13] : memref<2x8x256xf32, #tpu.memory_space<vmem>>, vector<1x8x256xf32>
    %14 = vector.shape_cast %13 : vector<1x8x256xf32> to vector<8x256xf32>
    %cst_14 = arith.constant dense<0.000000e+00> : vector<32x256xf32>
    %15 = tpu.matmul %12, %14, %cst_14 {dimension_numbers = #tpu.dot_dimension_numbers<[1], [0], [0], [1], [0, 0, 1, 1], [], []>} : vector<32x8xf32>, vector<8x256xf32>, vector<32x256xf32> -> vector<32x256xf32>
    %c1_15 = arith.constant 1 : index
    %c0_16 = arith.constant 0 : index
    %c0_17 = arith.constant 0 : index
    %16 = vector.load %arg4[%c1_15, %c0_16, %c0_17] : memref<2x32x256xf32, #tpu.memory_space<vmem>>, vector<1x32x256xf32>
    %17 = vector.shape_cast %16 : vector<1x32x256xf32> to vector<32x256xf32>
    %18 = vector.shape_cast %15 : vector<32x256xf32> to vector<1x32x256xf32>
    tpu.vector_store %arg4[%c1_15, %c0_16, %c0_17], %18 {strides = array<i32>} : memref<2x32x256xf32, #tpu.memory_space<vmem>>, vector<1x32x256xf32>,
    return
  }
  func.func @transform_0(%arg0: i32) -> (i32, i32) {
    %c0_i32 = arith.constant 0 : i32
    %c0_i32_0 = arith.constant 0 : i32
    %c0_i32_1 = arith.constant 0 : i32
    return %c0_i32, %c0_i32_0 : i32, i32
  }
  func.func @transform_1(%arg0: i32) -> (i32, i32, i32) {
    %c0_i32 = arith.constant 0 : i32
    %c0_i32_0 = arith.constant 0 : i32
    %c0_i32_1 = arith.constant 0 : i32
    %c0_i32_2 = arith.constant 0 : i32
    return %c0_i32, %c0_i32_0, %c0_i32_1 : i32, i32, i32
  }
  func.func @transform_2(%arg0: i32) -> (i32, i32, i32) {
    %c0_i32 = arith.constant 0 : i32
    %c0_i32_0 = arith.constant 0 : i32
    %c0_i32_1 = arith.constant 0 : i32
    return %c0_i32, %c0_i32_0, %arg0 : i32, i32, i32
  }
  func.func @transform_3(%arg0: i32) -> (i32, i32, i32) {
    %c0_i32 = arith.constant 0 : i32
    %c0_i32_0 = arith.constant 0 : i32
    %c0_i32_1 = arith.constant 0 : i32
    return %c0_i32, %c0_i32_0, %arg0 : i32, i32, i32
  }
}

</mosaic_0001>

<bundles_post_ra>
// kernel: tpu_custom_call.1
= control target key start
LH: loop header
LB: loop body
LE: loop exit
PB: predicated region body
PF: predicated region fallthrough
CT: control target
= control target key end

     0   :  { %vm27_vm0 = vcmask 261120   ;;  %s693_s0 = inlined_call_operand.vmem [shape: f32[32,32], index: 0, kind: input, shape index: {}]   ;;  %s694_s1 = inlined_call_operand.vmem [shape: f32[2,32,8], index: 1, kind: input, shape index: {}]   ;;  %s695_s2 = inlined_call_operand.vmem [shape: f32[2,8,256], index: 2, kind: input, shape index: {}]   ;;  %s696_s3 = inlined_call_operand.hbm [shape: f32[2,32,256], index: 3, kind: output, shape index: {}]  }
   0x1   :  { %v23_v0 = vld [vmem:[%s694_s1] sm:$0xff]  ;;  %v24_v1 = vld [vmem:[%s694_s1 + $0x8] sm:$0xff]  ;;  %v25_v5 = vld [vmem:[%s694_s1 + $0x10] sm:$0xff] }
   0x2   :  { %v479_v2 = vld [vmem:[%s694_s1 + $0x20] sm:$0xff]  ;;  %v541_v3 = vpack.c.bf16 %v24_v1, %v23_v0  ;;  %v480_v4 = vld [vmem:[%s694_s1 + $0x28] sm:$0xff]  ;;  %v26_v6 = vld [vmem:[%s694_s1 + $0x18] sm:$0xff] }
   0x3   :  { %v549_v7 = vpack.c.bf16 %v480_v4, %v479_v2  ;;  %v545_v8 = vpack.c.bf16 %v26_v6, %v25_v5  ;;  %v481_v9 = vld [vmem:[%s694_s1 + $0x30] sm:$0xff]  ;;  %v482_v10 = vld [vmem:[%s694_s1 + $0x38] sm:$0xff]  ;;  %v19_v11 = vld [vmem:[%s693_s0] sm:$0xff] }
   0x4   :  { %542 = vmatprep.subr.bf16.mxu0 %v541_v3  ;;  %v553_v12 = vpack.c.bf16 %v482_v10, %v481_v9  ;;  %521 = vmatprep.mubr.msk.f32.mxu0 %vm27_vm0, %v19_v11 }
   0x5   :  { %550 = vmatprep.subr.bf16.mxu1 %v549_v7  ;;  %544 = vmatpush3.bf16.msra.mxu0 %v541_v3 }
   0x6   :  { %8 = vsyncpa [#allocation4], 0  ;;  %552 = vmatpush3.bf16.msra.mxu1 %v549_v7  ;;  %546 = vmatprep.subr.bf16.mxu0 %v545_v8  ;;  %v20_v13 = vld [vmem:[%s693_s0 + $0x8] sm:$0xff]  ;;  %v21_v14 = vld [vmem:[%s693_s0 + $0x10] sm:$0xff]  ;;  %v585_v20 = vmov 0.0   ;;  %vm125_vm1 = vcmask 64512  }
   0x7   :  { %554 = vmatprep.subr.bf16.mxu1 %v553_v12  ;;  %535 = vmatprep.mubr.msk.f32.mxu1 %vm27_vm0, %v19_v11  ;;  %v22_v15 = vld [vmem:[%s693_s0 + $0x18] sm:$0xff]  ;;  %v230_v16 = vld [vmem:[%s695_s2 + $0x8] sm:$0xff]  ;;  %v229_v18 = vld [vmem:[%s695_s2] sm:$0xff] }
   0x8   :  { %v492_v17 = vld [vmem:[%s695_s2 + $0x18] sm:$0xff]  ;;  %v491_v19 = vld [vmem:[%s695_s2 + $0x10] sm:$0xff]  ;;  %s586_s2 = smov [#allocation3]  }
   0x9   :  { %548 = vmatpush3.bf16.msra.mxu0 %v545_v8  ;;  %s464_s15 = sshll.u32 %s586_s2, 4  ;;  %s465_s15 = int_to_ptr.vmem [resolvable:$true] %s464_s15 }
   0xa   :  { %556 = vmatpush3.bf16.msra.mxu1 %v553_v12  ;;  %244 = vmatprep.subr.mxu0 %v230_v16  ;;  %s561_s16 = scalar_lea.vmem %s465_s15, 2048  ;;  %p566_p1 = scmp.lt.s32.totalorder %s465_s15, %s465_s15 }
   0xb   :  { %361 = vmatprep.subr.mxu1 %v492_v17  ;;  %p562_p0 = scmp.ne.s32.totalorder %s465_s15, %s561_s16  ;;  %p567_p2 = scmp.lt.s32.totalorder %s561_s16, %s561_s16 }
   0xc   :  { %522 = vmatmul.mubr.msk.f32.vlgmr.msra.gmra.mrb[0].mxu0 %vm27_vm0, %v20_v13 }
   0xd   :  { %536 = vmatmul.mubr.msk.f32.vlgmr.msra.gmra.mrb[0].mxu1 %vm27_vm0, %v20_v13  ;;  %524 = vmatprep.mubr.msk.f32.mxu0 %vm27_vm0, %v21_v14  ;;  %p568_p3 = por %p567_p2, %p566_p1 }
   0xe   :  { %538 = vmatprep.mubr.msk.f32.mxu1 %vm27_vm0, %v21_v14  ;;  %245 = vmatpush1.msra.mxu0 %v229_v18 }
   0xf   :  { %362 = vmatpush1.msra.mxu1 %v491_v19  ;;  %p569_p4 = pnand %p568_p3, %p562_p0 }
  0x10   :  { %525 = vmatmul.mubr.msk.f32.gmra.mrb[2].mxu0 %vm27_vm0, %v22_v15 }
  0x11   :  { %539 = vmatmul.mubr.msk.f32.gmra.mrb[2].mxu1 %vm27_vm0, %v22_v15  ;;  %308 = vmatprep.mubr.f32.mxu0 %v585_v20 }
  0x12   :  { %425 = vmatprep.mubr.f32.mxu1 %v585_v20 }
  0xdf   :  { %v523_v21 = vpop.f32.mrb[0].mxu0 }
  0xe0   :  { %127 = vst.msk [vmem:[#allocation2 + $0x8] sm:$0xff] %vm125_vm1, %v523_v21  ;;  %v537_v22 = vpop.f32.mrb[0].mxu1  ;;  %v106_v23 = vpop.f32.mrb[1].mxu0 }
  0xe1   :  { %222 = vst.msk [vmem:[#allocation2 + $0x28] sm:$0xff] %vm125_vm1, %v537_v22  ;;  %126 = vst.msk [vmem:[#allocation2] sm:$0xff] %vm125_vm1, %v106_v23  ;;  %v201_v24 = vpop.f32.mrb[1].mxu1 }
  0xe2   :  { %221 = vst.msk [vmem:[#allocation2 + $0x20] sm:$0xff] %vm125_vm1, %v201_v24 }
  0xe3   :  { %v526_v25 = vpop.f32.mrb[2].mxu0 }
  0xe4   :  { %129 = vst.msk [vmem:[#allocation2 + $0x18] sm:$0xff] %vm125_vm1, %v526_v25  ;;  %v540_v26 = vpop.f32.mrb[2].mxu1  ;;  %v116_v27 = vpop.f32.mrb[3].mxu0 }
  0xe5   :  { %224 = vst.msk [vmem:[#allocation2 + $0x38] sm:$0xff] %vm125_vm1, %v540_v26  ;;  %128 = vst.msk [vmem:[#allocation2 + $0x10] sm:$0xff] %vm125_vm1, %v116_v27  ;;  %v211_v28 = vpop.f32.mrb[3].mxu1 }
  0xe6   :  { %223 = vst.msk [vmem:[#allocation2 + $0x30] sm:$0xff] %vm125_vm1, %v211_v28 }
  0xe7   :  { %v226_v31 = vld [vmem:[#allocation2 + $0x8] sm:$0xff] }
  0xe8   :  { %v225_v29 = vld [vmem:[#allocation2] sm:$0xff]  ;;  %v343_v32 = vld [vmem:[#allocation2 + $0x28] sm:$0xff] }
  0xe9   :  { %487 = vmatmul.mubr.msk.f32.vlgmr.msra.gmra.mrb[4].mxu0 %vm125_vm1, %v225_v29  ;;  %v342_v30 = vld [vmem:[#allocation2 + $0x20] sm:$0xff] }
  0xea   :  { %493 = vmatmul.mubr.msk.f32.vlgmr.msra.gmra.mrb[4].mxu1 %vm125_vm1, %v342_v30  ;;  %314 = vmatprep.mubr.f32.mxu0 %v585_v20 }
  0xeb   :  { %431 = vmatprep.mubr.f32.mxu1 %v585_v20  ;;  %v228_v35 = vld [vmem:[#allocation2 + $0x18] sm:$0xff] }
  0xec   :  { %v227_v33 = vld [vmem:[#allocation2 + $0x10] sm:$0xff]  ;;  %v345_v36 = vld [vmem:[#allocation2 + $0x38] sm:$0xff] }
  0xed   :  { %488 = vmatmul.mubr.msk.f32.gmra.mrb[6].mxu0 %vm125_vm1, %v226_v31  ;;  %v344_v34 = vld [vmem:[#allocation2 + $0x30] sm:$0xff] }
  0xee   :  { %494 = vmatmul.mubr.msk.f32.gmra.mrb[6].mxu1 %vm125_vm1, %v343_v32  ;;  %320 = vmatprep.mubr.f32.mxu0 %v585_v20 }
  0xef   :  { %437 = vmatprep.mubr.f32.mxu1 %v585_v20 }
  0xf1   :  { %489 = vmatmul.mubr.msk.f32.gmra.mrb[8].mxu0 %vm125_vm1, %v227_v33 }
  0xf2   :  { %495 = vmatmul.mubr.msk.f32.gmra.mrb[8].mxu1 %vm125_vm1, %v344_v34  ;;  %326 = vmatprep.mubr.f32.mxu0 %v585_v20 }
  0xf3   :  { %443 = vmatprep.mubr.f32.mxu1 %v585_v20 }
  0xf5   :  { %490 = vmatmul.mubr.msk.f32.gmra.mrb[10].mxu0 %vm125_vm1, %v228_v35 }
  0xf6   :  { %496 = vmatmul.mubr.msk.f32.gmra.mrb[10].mxu1 %vm125_vm1, %v345_v36 }
 0x1bc   :  { %v310_v37 = vpop.f32.mrb[4].mxu0 }
 0x1bd   :  { %333 = vst [vmem:[#allocation3] sm:$0xff] %v310_v37  ;;  %v427_v38 = vpop.f32.mrb[4].mxu1  ;;  %v312_v39 = vpop.f32.mrb[5].mxu0 }
 0x1be   :  { %451 = vst [vmem:[#allocation3 + $0x40] sm:$0xff] %v427_v38  ;;  %334 = vst [vmem:[#allocation3 + $0x8] sm:$0xff] %v312_v39  ;;  %v429_v40 = vpop.f32.mrb[5].mxu1 }
 0x1bf   :  { %452 = vst [vmem:[#allocation3 + $0x48] sm:$0xff] %v429_v40 }
 0x1c0   :  { %v316_v41 = vpop.f32.mrb[6].mxu0 }
 0x1c1   :  { %335 = vst [vmem:[#allocation3 + $0x10] sm:$0xff] %v316_v41  ;;  %v433_v42 = vpop.f32.mrb[6].mxu1  ;;  %v318_v43 = vpop.f32.mrb[7].mxu0 }
 0x1c2   :  { %453 = vst [vmem:[#allocation3 + $0x50] sm:$0xff] %v433_v42  ;;  %336 = vst [vmem:[#allocation3 + $0x18] sm:$0xff] %v318_v43  ;;  %v435_v44 = vpop.f32.mrb[7].mxu1 }
 0x1c3   :  { %454 = vst [vmem:[#allocation3 + $0x58] sm:$0xff] %v435_v44 }
 0x1c4   :  { %v322_v45 = vpop.f32.mrb[8].mxu0 }
 0x1c5   :  { %337 = vst [vmem:[#allocation3 + $0x20] sm:$0xff] %v322_v45  ;;  %v439_v46 = vpop.f32.mrb[8].mxu1  ;;  %v324_v47 = vpop.f32.mrb[9].mxu0 }
 0x1c6   :  { %455 = vst [vmem:[#allocation3 + $0x60] sm:$0xff] %v439_v46  ;;  %338 = vst [vmem:[#allocation3 + $0x28] sm:$0xff] %v324_v47  ;;  %v441_v48 = vpop.f32.mrb[9].mxu1 }
 0x1c7   :  { %456 = vst [vmem:[#allocation3 + $0x68] sm:$0xff] %v441_v48 }
 0x1c8   :  { %v328_v49 = vpop.f32.mrb[10].mxu0 }
 0x1c9   :  { %339 = vst [vmem:[#allocation3 + $0x30] sm:$0xff] %v328_v49  ;;  %v445_v50 = vpop.f32.mrb[10].mxu1  ;;  %v330_v51 = vpop.f32.mrb[11].mxu0 }
 0x1ca   :  { %457 = vst [vmem:[#allocation3 + $0x70] sm:$0xff] %v445_v50  ;;  %340 = vst [vmem:[#allocation3 + $0x38] sm:$0xff] %v330_v51  ;;  %v447_v52 = vpop.f32.mrb[11].mxu1 }
 0x1cb   :  { %458 = vst [vmem:[#allocation3 + $0x78] sm:$0xff] %v447_v52 }
 0x1cc   :  { %572 = shalt.err (!%p569_p4)
}
 0x1cd   :  { %s573_s19 = scalar_lea.hbm %s696_s3, 2048 }
 0x1ce   :  { %p574_p5 = scmp.ne.s32.totalorder %s696_s3, %s573_s19  ;;  %p577_p6 = scmp.lt.u32.totalorder %s573_s19, %s696_s3 }
 0x1d0   :  { %p579_p7 = pnand %p577_p6, %p574_p5 }
 0x1d2   :  { %582 = shalt.err (!%p579_p7)
}
 0x1d3   :  { %s587_s24 = smov 256   ;;  %s588_s25 = smov 16  }
 0x1d4   :  { %470 = dma.vmem_to_hbm [thread:$0]  %s465_s15, 2048, %s696_s3, [#allocation4], %s587_s24, %s587_s24, %s588_s25  }
 0x1d5   :  { %583 = dma.done.wait [#allocation4], 2048  }
 0x1d6   :  { %584 = vsyncadd [#allocation4], 4294965248 }
 0x1d7   :  { %474 = vsyncpa [#allocation4], 1 }

</bundles_post_ra>
